<compile_context>
chip_gen: v7x
topology: tpu7x:2x2x1
jax: 0.10.0
libtpu: 0.0.40
codegen_flags: <defaults>
</compile_context>

<pallas_src>
import functools

import jax
import jax.numpy as jnp
from jax import lax
from jax.experimental import pallas as pl
from jax.experimental.pallas import tpu as pltpu


def _geometry_prior_kernel(pos_ref, w1_ref, b1_ref, w2_ref, b2_ref, o_ref, *,
                           mid):
    pos = pos_ref[...]                      # (2, kk_pad) f32, lane-dense
    w1m = w1_ref[...]                       # (mid, 2)

    # Layer 1: 1x1 conv with K=2 contraction -> two VPU FMAs (an MXU dot
    # would pad K to 128/256 and pay a full fill/drain for ~2% utilization).
    h = (w1m[:, 0:1] * pos[0:1, :]
         + w1m[:, 1:2] * pos[1:2, :]
         + b1_ref[...])
    h = jnp.maximum(h, 0.0)                 # (mid, kk_pad)

    w2m = w2_ref[...]                       # (channels, mid)
    if mid <= 32:
        # Layer 2 as an unrolled VPU FMA chain (mid is tiny) — skip the MXU
        # entirely so the kernel is purely VPU/store-bound.
        acc = w2m[:, 0:1] * h[0:1, :]
        for j in range(1, mid):
            acc = acc + w2m[:, j:j + 1] * h[j:j + 1, :]
    else:
        # Larger hidden widths: fall back to a single MXU matmul.
        acc = jnp.dot(w2m, h, preferred_element_type=jnp.float32)

    o_ref[...] = (acc + b2_ref[...]).astype(o_ref.dtype)


def geometry_prior_forward(x, position, w1, b1, w2, b2, *, k, channels):
    """Mirrors GeometryPrior.forward.  `x` is ignored (as in the PyTorch code).

    position: (1, 2, k, k)
    w1: (mid, 2, 1, 1), b1: (mid,)
    w2: (channels, mid, 1, 1), b2: (channels,)
    returns: (1, channels, 1, k*k)
    """
    del x  # unused by the reference forward pass
    mid = w1.shape[0]
    kk = k * k
    kk_pad = ((kk + 127) // 128) * 128      # lane-dense spatial axis

    # Glue: flatten spatial dims, squeeze 1x1 conv kernels, pad lanes to 128.
    pos2d = position.reshape(2, kk).astype(jnp.float32)
    if kk_pad != kk:
        pos2d = jnp.pad(pos2d, ((0, 0), (0, kk_pad - kk)))
    w1m = w1.reshape(mid, 2)
    b1c = b1.reshape(mid, 1)
    w2m = w2.reshape(channels, mid)
    b2c = b2.reshape(channels, 1)

    kernel = functools.partial(_geometry_prior_kernel, mid=mid)
    vmem = pl.BlockSpec(memory_space=pltpu.MemorySpace.VMEM)

    out = pl.pallas_call(
        kernel,
        out_shape=jax.ShapeDtypeStruct((channels, kk_pad), jnp.float32),
        in_specs=[vmem, vmem, vmem, vmem, vmem],
        out_specs=vmem,
    )(pos2d, w1m, b1c, w2m, b2c)

    # Drop pad lanes, then present the PyTorch output layout.
    return out[:, :kk].reshape(1, channels, 1, kk)


if __name__ == "__main__":
    # Module hyperparameters (small, consistent with the module's __init__).
    k = 8
    channels = 32
    multiplier = 0.5
    mid = int(multiplier * channels)

    key = jax.random.PRNGKey(0)
    k_pos, k_w1, k_b1, k_w2, k_b2, k_x = jax.random.split(key, 6)

    # position = 2 * rand(1, 2, k, k) - 1   (uniform in [-1, 1))
    position = 2.0 * jax.random.uniform(k_pos, (1, 2, k, k),
                                        dtype=jnp.float32) - 1.0

    # Deterministic synthetic conv parameters (shapes per nn.Conv2d(..., 1)).
    w1 = jax.random.normal(k_w1, (mid, 2, 1, 1), dtype=jnp.float32) * 0.1
    b1 = jax.random.normal(k_b1, (mid,), dtype=jnp.float32) * 0.1
    w2 = jax.random.normal(k_w2, (channels, mid, 1, 1), dtype=jnp.float32) * 0.1
    b2 = jax.random.normal(k_b2, (channels,), dtype=jnp.float32) * 0.1

    # Example input x (unused by forward, kept for interface fidelity).
    x = jax.random.normal(k_x, (2, 4, 16, 16), dtype=jnp.float32)

    out = geometry_prior_forward(x, position, w1, b1, w2, b2,
                                 k=k, channels=channels)
    out = jax.block_until_ready(out)

    # Pure-JAX reference (full-precision f32 matmuls) for a sanity check.
    pos2d = position.reshape(2, k * k)
    hi = jnp.dot(w1.reshape(mid, 2), pos2d,
                 precision=lax.Precision.HIGHEST) + b1[:, None]
    hi = jnp.maximum(hi, 0.0)
    ref = jnp.dot(w2.reshape(channels, mid), hi,
                  precision=lax.Precision.HIGHEST) + b2[:, None]
    ref = ref.reshape(1, channels, 1, k * k)

    assert out.shape == (1, channels, 1, k * k), out.shape
    assert jnp.allclose(out, ref, atol=1e-5, rtol=1e-5), "mismatch vs reference"

    print("KERNEL_OK")
</pallas_src>

<mosaic_0001>
module attributes {stable_mosaic.version = 11 : i64} {
  func.func @_geometry_prior_kernel(%arg0: memref<2x128xf32, #tpu.memory_space<vmem>>, %arg1: memref<16x2xf32, #tpu.memory_space<vmem>>, %arg2: memref<16x1xf32, #tpu.memory_space<vmem>>, %arg3: memref<32x16xf32, #tpu.memory_space<vmem>>, %arg4: memref<32x1xf32, #tpu.memory_space<vmem>>, %arg5: memref<32x128xf32, #tpu.memory_space<vmem>>) attributes {dimension_semantics = [], scalar_prefetch = 0 : i64, scratch_operands = 0 : i64, tpu.core_type = #tpu.core_type<tc>} {
    %c0 = arith.constant 0 : index
    %c0_0 = arith.constant 0 : index
    %0 = vector.load %arg0[%c0, %c0_0] : memref<2x128xf32, #tpu.memory_space<vmem>>, vector<2x128xf32>
    %c0_1 = arith.constant 0 : index
    %c0_2 = arith.constant 0 : index
    %1 = vector.load %arg1[%c0_1, %c0_2] : memref<16x2xf32, #tpu.memory_space<vmem>>, vector<16x2xf32>
    %2 = vector.extract_strided_slice %1 {offsets = [0, 0], sizes = [16, 1], strides = [1, 1]} : vector<16x2xf32> to vector<16x1xf32>
    %3 = vector.extract_strided_slice %0 {offsets = [0, 0], sizes = [1, 128], strides = [1, 1]} : vector<2x128xf32> to vector<1x128xf32>
    %4 = vector.broadcast %2 : vector<16x1xf32> to vector<16x128xf32>
    %5 = vector.broadcast %3 : vector<1x128xf32> to vector<16x128xf32>
    %6 = arith.mulf %4, %5 : vector<16x128xf32>
    %7 = vector.extract_strided_slice %1 {offsets = [0, 1], sizes = [16, 1], strides = [1, 1]} : vector<16x2xf32> to vector<16x1xf32>
    %8 = vector.extract_strided_slice %0 {offsets = [1, 0], sizes = [1, 128], strides = [1, 1]} : vector<2x128xf32> to vector<1x128xf32>
    %9 = vector.broadcast %7 : vector<16x1xf32> to vector<16x128xf32>
    %10 = vector.broadcast %8 : vector<1x128xf32> to vector<16x128xf32>
    %11 = arith.mulf %9, %10 : vector<16x128xf32>
    %12 = arith.addf %6, %11 : vector<16x128xf32>
    %c0_3 = arith.constant 0 : index
    %c0_4 = arith.constant 0 : index
    %13 = vector.load %arg2[%c0_3, %c0_4] : memref<16x1xf32, #tpu.memory_space<vmem>>, vector<16x1xf32>
    %14 = vector.broadcast %13 : vector<16x1xf32> to vector<16x128xf32>
    %15 = arith.addf %12, %14 : vector<16x128xf32>
    %cst = arith.constant 0.000000e+00 : f32
    %16 = vector.broadcast %cst : f32 to vector<16x128xf32>
    %17 = arith.maximumf %15, %16 : vector<16x128xf32>
    %c0_5 = arith.constant 0 : index
    %c0_6 = arith.constant 0 : index
    %18 = vector.load %arg3[%c0_5, %c0_6] : memref<32x16xf32, #tpu.memory_space<vmem>>, vector<32x16xf32>
    %19 = vector.extract_strided_slice %18 {offsets = [0, 0], sizes = [32, 1], strides = [1, 1]} : vector<32x16xf32> to vector<32x1xf32>
    %20 = vector.extract_strided_slice %17 {offsets = [0, 0], sizes = [1, 128], strides = [1, 1]} : vector<16x128xf32> to vector<1x128xf32>
    %21 = vector.broadcast %19 : vector<32x1xf32> to vector<32x128xf32>
    %22 = vector.broadcast %20 : vector<1x128xf32> to vector<32x128xf32>
    %23 = arith.mulf %21, %22 : vector<32x128xf32>
    %24 = vector.extract_strided_slice %18 {offsets = [0, 1], sizes = [32, 1], strides = [1, 1]} : vector<32x16xf32> to vector<32x1xf32>
    %25 = vector.extract_strided_slice %17 {offsets = [1, 0], sizes = [1, 128], strides = [1, 1]} : vector<16x128xf32> to vector<1x128xf32>
    %26 = vector.broadcast %24 : vector<32x1xf32> to vector<32x128xf32>
    %27 = vector.broadcast %25 : vector<1x128xf32> to vector<32x128xf32>
    %28 = arith.mulf %26, %27 : vector<32x128xf32>
    %29 = arith.addf %23, %28 : vector<32x128xf32>
    %30 = vector.extract_strided_slice %18 {offsets = [0, 2], sizes = [32, 1], strides = [1, 1]} : vector<32x16xf32> to vector<32x1xf32>
    %31 = vector.extract_strided_slice %17 {offsets = [2, 0], sizes = [1, 128], strides = [1, 1]} : vector<16x128xf32> to vector<1x128xf32>
    %32 = vector.broadcast %30 : vector<32x1xf32> to vector<32x128xf32>
    %33 = vector.broadcast %31 : vector<1x128xf32> to vector<32x128xf32>
    %34 = arith.mulf %32, %33 : vector<32x128xf32>
    %35 = arith.addf %29, %34 : vector<32x128xf32>
    %36 = vector.extract_strided_slice %18 {offsets = [0, 3], sizes = [32, 1], strides = [1, 1]} : vector<32x16xf32> to vector<32x1xf32>
    %37 = vector.extract_strided_slice %17 {offsets = [3, 0], sizes = [1, 128], strides = [1, 1]} : vector<16x128xf32> to vector<1x128xf32>
    %38 = vector.broadcast %36 : vector<32x1xf32> to vector<32x128xf32>
    %39 = vector.broadcast %37 : vector<1x128xf32> to vector<32x128xf32>
    %40 = arith.mulf %38, %39 : vector<32x128xf32>
    %41 = arith.addf %35, %40 : vector<32x128xf32>
    %42 = vector.extract_strided_slice %18 {offsets = [0, 4], sizes = [32, 1], strides = [1, 1]} : vector<32x16xf32> to vector<32x1xf32>
    %43 = vector.extract_strided_slice %17 {offsets = [4, 0], sizes = [1, 128], strides = [1, 1]} : vector<16x128xf32> to vector<1x128xf32>
    %44 = vector.broadcast %42 : vector<32x1xf32> to vector<32x128xf32>
    %45 = vector.broadcast %43 : vector<1x128xf32> to vector<32x128xf32>
    %46 = arith.mulf %44, %45 : vector<32x128xf32>
    %47 = arith.addf %41, %46 : vector<32x128xf32>
    %48 = vector.extract_strided_slice %18 {offsets = [0, 5], sizes = [32, 1], strides = [1, 1]} : vector<32x16xf32> to vector<32x1xf32>
    %49 = vector.extract_strided_slice %17 {offsets = [5, 0], sizes = [1, 128], strides = [1, 1]} : vector<16x128xf32> to vector<1x128xf32>
    %50 = vector.broadcast %48 : vector<32x1xf32> to vector<32x128xf32>
    %51 = vector.broadcast %49 : vector<1x128xf32> to vector<32x128xf32>
    %52 = arith.mulf %50, %51 : vector<32x128xf32>
    %53 = arith.addf %47, %52 : vector<32x128xf32>
    %54 = vector.extract_strided_slice %18 {offsets = [0, 6], sizes = [32, 1], strides = [1, 1]} : vector<32x16xf32> to vector<32x1xf32>
    %55 = vector.extract_strided_slice %17 {offsets = [6, 0], sizes = [1, 128], strides = [1, 1]} : vector<16x128xf32> to vector<1x128xf32>
    %56 = vector.broadcast %54 : vector<32x1xf32> to vector<32x128xf32>
    %57 = vector.broadcast %55 : vector<1x128xf32> to vector<32x128xf32>
    %58 = arith.mulf %56, %57 : vector<32x128xf32>
    %59 = arith.addf %53, %58 : vector<32x128xf32>
    %60 = vector.extract_strided_slice %18 {offsets = [0, 7], sizes = [32, 1], strides = [1, 1]} : vector<32x16xf32> to vector<32x1xf32>
    %61 = vector.extract_strided_slice %17 {offsets = [7, 0], sizes = [1, 128], strides = [1, 1]} : vector<16x128xf32> to vector<1x128xf32>
    %62 = vector.broadcast %60 : vector<32x1xf32> to vector<32x128xf32>
    %63 = vector.broadcast %61 : vector<1x128xf32> to vector<32x128xf32>
    %64 = arith.mulf %62, %63 : vector<32x128xf32>
    %65 = arith.addf %59, %64 : vector<32x128xf32>
    %66 = vector.extract_strided_slice %18 {offsets = [0, 8], sizes = [32, 1], strides = [1, 1]} : vector<32x16xf32> to vector<32x1xf32>
    %67 = vector.extract_strided_slice %17 {offsets = [8, 0], sizes = [1, 128], strides = [1, 1]} : vector<16x128xf32> to vector<1x128xf32>
    %68 = vector.broadcast %66 : vector<32x1xf32> to vector<32x128xf32>
    %69 = vector.broadcast %67 : vector<1x128xf32> to vector<32x128xf32>
    %70 = arith.mulf %68, %69 : vector<32x128xf32>
    %71 = arith.addf %65, %70 : vector<32x128xf32>
    %72 = vector.extract_strided_slice %18 {offsets = [0, 9], sizes = [32, 1], strides = [1, 1]} : vector<32x16xf32> to vector<32x1xf32>
    %73 = vector.extract_strided_slice %17 {offsets = [9, 0], sizes = [1, 128], strides = [1, 1]} : vector<16x128xf32> to vector<1x128xf32>
    %74 = vector.broadcast %72 : vector<32x1xf32> to vector<32x128xf32>
    %75 = vector.broadcast %73 : vector<1x128xf32> to vector<32x128xf32>
    %76 = arith.mulf %74, %75 : vector<32x128xf32>
    %77 = arith.addf %71, %76 : vector<32x128xf32>
    %78 = vector.extract_strided_slice %18 {offsets = [0, 10], sizes = [32, 1], strides = [1, 1]} : vector<32x16xf32> to vector<32x1xf32>
    %79 = vector.extract_strided_slice %17 {offsets = [10, 0], sizes = [1, 128], strides = [1, 1]} : vector<16x128xf32> to vector<1x128xf32>
    %80 = vector.broadcast %78 : vector<32x1xf32> to vector<32x128xf32>
    %81 = vector.broadcast %79 : vector<1x128xf32> to vector<32x128xf32>
    %82 = arith.mulf %80, %81 : vector<32x128xf32>
    %83 = arith.addf %77, %82 : vector<32x128xf32>
    %84 = vector.extract_strided_slice %18 {offsets = [0, 11], sizes = [32, 1], strides = [1, 1]} : vector<32x16xf32> to vector<32x1xf32>
    %85 = vector.extract_strided_slice %17 {offsets = [11, 0], sizes = [1, 128], strides = [1, 1]} : vector<16x128xf32> to vector<1x128xf32>
    %86 = vector.broadcast %84 : vector<32x1xf32> to vector<32x128xf32>
    %87 = vector.broadcast %85 : vector<1x128xf32> to vector<32x128xf32>
    %88 = arith.mulf %86, %87 : vector<32x128xf32>
    %89 = arith.addf %83, %88 : vector<32x128xf32>
    %90 = vector.extract_strided_slice %18 {offsets = [0, 12], sizes = [32, 1], strides = [1, 1]} : vector<32x16xf32> to vector<32x1xf32>
    %91 = vector.extract_strided_slice %17 {offsets = [12, 0], sizes = [1, 128], strides = [1, 1]} : vector<16x128xf32> to vector<1x128xf32>
    %92 = vector.broadcast %90 : vector<32x1xf32> to vector<32x128xf32>
    %93 = vector.broadcast %91 : vector<1x128xf32> to vector<32x128xf32>
    %94 = arith.mulf %92, %93 : vector<32x128xf32>
    %95 = arith.addf %89, %94 : vector<32x128xf32>
    %96 = vector.extract_strided_slice %18 {offsets = [0, 13], sizes = [32, 1], strides = [1, 1]} : vector<32x16xf32> to vector<32x1xf32>
    %97 = vector.extract_strided_slice %17 {offsets = [13, 0], sizes = [1, 128], strides = [1, 1]} : vector<16x128xf32> to vector<1x128xf32>
    %98 = vector.broadcast %96 : vector<32x1xf32> to vector<32x128xf32>
    %99 = vector.broadcast %97 : vector<1x128xf32> to vector<32x128xf32>
    %100 = arith.mulf %98, %99 : vector<32x128xf32>
    %101 = arith.addf %95, %100 : vector<32x128xf32>
    %102 = vector.extract_strided_slice %18 {offsets = [0, 14], sizes = [32, 1], strides = [1, 1]} : vector<32x16xf32> to vector<32x1xf32>
    %103 = vector.extract_strided_slice %17 {offsets = [14, 0], sizes = [1, 128], strides = [1, 1]} : vector<16x128xf32> to vector<1x128xf32>
    %104 = vector.broadcast %102 : vector<32x1xf32> to vector<32x128xf32>
    %105 = vector.broadcast %103 : vector<1x128xf32> to vector<32x128xf32>
    %106 = arith.mulf %104, %105 : vector<32x128xf32>
    %107 = arith.addf %101, %106 : vector<32x128xf32>
    %108 = vector.extract_strided_slice %18 {offsets = [0, 15], sizes = [32, 1], strides = [1, 1]} : vector<32x16xf32> to vector<32x1xf32>
    %109 = vector.extract_strided_slice %17 {offsets = [15, 0], sizes = [1, 128], strides = [1, 1]} : vector<16x128xf32> to vector<1x128xf32>
    %110 = vector.broadcast %108 : vector<32x1xf32> to vector<32x128xf32>
    %111 = vector.broadcast %109 : vector<1x128xf32> to vector<32x128xf32>
    %112 = arith.mulf %110, %111 : vector<32x128xf32>
    %113 = arith.addf %107, %112 : vector<32x128xf32>
    %c0_7 = arith.constant 0 : index
    %c0_8 = arith.constant 0 : index
    %114 = vector.load %arg4[%c0_7, %c0_8] : memref<32x1xf32, #tpu.memory_space<vmem>>, vector<32x1xf32>
    %115 = vector.broadcast %114 : vector<32x1xf32> to vector<32x128xf32>
    %116 = arith.addf %113, %115 : vector<32x128xf32>
    %c0_9 = arith.constant 0 : index
    %c0_10 = arith.constant 0 : index
    %117 = vector.load %arg5[%c0_9, %c0_10] : memref<32x128xf32, #tpu.memory_space<vmem>>, vector<32x128xf32>
    tpu.vector_store %arg5[%c0_9, %c0_10], %116 {strides = array<i32>} : memref<32x128xf32, #tpu.memory_space<vmem>>, vector<32x128xf32>,
    return
  }
}

</mosaic_0001>

<bundles_post_ra>
// kernel: tpu_custom_call.1
= control target key start
LH: loop header
LB: loop body
LE: loop exit
PB: predicated region body
PF: predicated region fallthrough
CT: control target
= control target key end

     0   :  { %v650_v1 = vmov 1   ;;  %v651_v2 = vmov 0   ;;  %s899_s0 = inlined_call_operand.vmem [shape: f32[2,128], index: 0, kind: input, shape index: {}]   ;;  %s900_s1 = inlined_call_operand.vmem [shape: f32[16,2], index: 1, kind: input, shape index: {}]   ;;  %s901_s2 = inlined_call_operand.vmem [shape: f32[16,1], index: 2, kind: input, shape index: {}]   ;;  %s902_s3 = inlined_call_operand.vmem [shape: f32[32,16], index: 3, kind: input, shape index: {}]   ;;  %s903_s4 = inlined_call_operand.vmem [shape: f32[32,1], index: 4, kind: input, shape index: {}]   ;;  %s904_s5 = inlined_call_operand.hbm [shape: f32[32,128], index: 5, kind: output, shape index: {}]  }
   0x1   :  { %v22_v0 = vld [vmem:[%s900_s1] sm:$0xff]  ;;  %592 = vset.pattern.permute.xlu1 %v650_v1  ;;  %591 = vset.pattern.permute.xlu0 %v651_v2  ;;  %v23_v3 = vld [vmem:[%s900_s1 + $0x8] sm:$0xff] }
   0x2   :  { %41 = vperm.xlu1 %592, %v22_v0   ;;  %26 = vperm.xlu0 %591, %v22_v0  }
   0x3   :  { %10 = vsyncpa [#allocation3], 0  ;;  %v56_v4 = vld [vmem:[%s901_s2] sm:$0xff]  ;;  %v57_v5 = vld [vmem:[%s901_s2 + $0x8] sm:$0xff]  ;;  %v652_v10 = vmov 2   ;;  %v653_v11 = vmov 3   ;;  %v34_v22 = vlaneseq }
   0x4   :  { %v716_v6 = vld [vmem:[%s902_s3] sm:$0xff]  ;;  %v721_v7 = vld [vmem:[%s902_s3 + $0x8] sm:$0xff]  ;;  %v728_v8 = vld [vmem:[%s902_s3 + $0x10] sm:$0xff]  ;;  %v654_v12 = vmov 4   ;;  %v655_v13 = vmov 5   ;;  %v656_v14 = vmov 6  }
   0x5   :  { %v733_v9 = vld [vmem:[%s902_s3 + $0x18] sm:$0xff]  ;;  %v657_v15 = vmov 7   ;;  %v658_v16 = vmov 8   ;;  %v659_v17 = vmov 9   ;;  %v660_v18 = vmov 10   ;;  %v525_v31 = vld [vmem:[%s903_s4 + $0x8] sm:$0xff] }
   0x6   :  { %45 = vperm.xlu1 %592, %v23_v3   ;;  %31 = vperm.xlu0 %591, %v23_v3   ;;  %v661_v19 = vmov 11   ;;  %v662_v20 = vmov 12   ;;  %v663_v21 = vmov 13   ;;  %v664_v23 = vmov 14   ;;  %v21_v28 = vld [vmem:[%s899_s0] sm:$0x3] }
   0x7   :  { %v782_v24 = vshrl.u32 %v34_v22, 7  ;;  %v665_v25 = vmov 15  }
   0x9   :  { %v788_v26 = vsub.s32 1, %v782_v24  ;;  %v791_v27 = vsub.s32 0, %v782_v24  ;;  %v150_v0 = vsub.s32 2, %v782_v24 }
   0xa   :  { %593 = vset.pattern.permute.xlu1 %v651_v2  ;;  %60 = vperm.xlu0 %591, %v56_v4  }
   0xb   :  { %65 = vperm.xlu1 %593, %v57_v5   ;;  %v51_v29 = vrot.slane %v21_v28, %v788_v26  ;;  %v37_v30 = vrot.slane %v21_v28, %v791_v27 }
   0xe   :  { %78 = vperm.xlu0 %591, %v716_v6  }
   0xf   :  { %83 = vperm.xlu1 %593, %v721_v7  }
  0x12   :  { %88 = vperm.xlu0 %591, %v728_v8  }
  0x13   :  { %93 = vperm.xlu1 %593, %v733_v9  }
  0x16   :  { %594 = vset.pattern.permute.xlu0 %v650_v1 }
  0x17   :  { %595 = vset.pattern.permute.xlu1 %v650_v1  ;;  %105 = vperm.xlu0 %594, %v716_v6  }
  0x18   :  { %109 = vperm.xlu1 %595, %v721_v7  }
  0x1b   :  { %117 = vperm.xlu0 %594, %v733_v9  }
  0x1c   :  { %113 = vperm.xlu1 %595, %v728_v8  }
  0x1f   :  { %597 = vset.pattern.permute.xlu0 %v652_v10 }
  0x20   :  { %596 = vset.pattern.permute.xlu1 %v652_v10  ;;  %137 = vperm.xlu0 %597, %v721_v7  }
  0x21   :  { %133 = vperm.xlu1 %596, %v716_v6  }
  0x24   :  { %598 = vset.pattern.permute.xlu0 %v653_v11 }
  0x25   :  { %141 = vperm.xlu1 %596, %v728_v8   ;;  %161 = vperm.xlu0 %598, %v716_v6  }
  0x29   :  { %145 = vperm.xlu1 %596, %v733_v9   ;;  %173 = vperm.xlu0 %598, %v733_v9  }
  0x2d   :  { %599 = vset.pattern.permute.xlu1 %v653_v11  ;;  %601 = vset.pattern.permute.xlu0 %v654_v12 }
  0x2e   :  { %165 = vperm.xlu1 %599, %v721_v7   ;;  %193 = vperm.xlu0 %601, %v721_v7  }
  0x32   :  { %169 = vperm.xlu1 %599, %v728_v8   ;;  %602 = vset.pattern.permute.xlu0 %v655_v13 }
  0x33   :  { %217 = vperm.xlu0 %602, %v716_v6  }
  0x36   :  { %600 = vset.pattern.permute.xlu1 %v654_v12 }
  0x37   :  { %189 = vperm.xlu1 %600, %v716_v6   ;;  %229 = vperm.xlu0 %602, %v733_v9  }
  0x3b   :  { %197 = vperm.xlu1 %600, %v728_v8   ;;  %605 = vset.pattern.permute.xlu0 %v656_v14 }
  0x3c   :  { %249 = vperm.xlu0 %605, %v721_v7  }
  0x3f   :  { %201 = vperm.xlu1 %600, %v733_v9  }
  0x40   :  { %606 = vset.pattern.permute.xlu0 %v657_v15 }
  0x41   :  { %273 = vperm.xlu0 %606, %v716_v6  }
  0x43   :  { %603 = vset.pattern.permute.xlu1 %v655_v13  ;;  %v178_v13 = vsub.s32 3, %v782_v24 }
  0x44   :  { %221 = vperm.xlu1 %603, %v721_v7  }
  0x45   :  { %285 = vperm.xlu0 %606, %v733_v9  }
  0x48   :  { %225 = vperm.xlu1 %603, %v728_v8  }
  0x49   :  { %609 = vset.pattern.permute.xlu0 %v658_v16 }
  0x4a   :  { %305 = vperm.xlu0 %609, %v721_v7  }
  0x4c   :  { %604 = vset.pattern.permute.xlu1 %v656_v14 }
  0x4d   :  { %245 = vperm.xlu1 %604, %v716_v6  }
  0x4e   :  { %610 = vset.pattern.permute.xlu0 %v659_v17 }
  0x4f   :  { %329 = vperm.xlu0 %610, %v716_v6  }
  0x51   :  { %253 = vperm.xlu1 %604, %v728_v8  }
  0x53   :  { %341 = vperm.xlu0 %610, %v733_v9  }
  0x55   :  { %257 = vperm.xlu1 %604, %v733_v9  }
  0x57   :  { %613 = vset.pattern.permute.xlu0 %v660_v18 }
  0x58   :  { %361 = vperm.xlu0 %613, %v721_v7  }
  0x59   :  { %607 = vset.pattern.permute.xlu1 %v657_v15 }
  0x5a   :  { %277 = vperm.xlu1 %607, %v721_v7  }
  0x5c   :  { %614 = vset.pattern.permute.xlu0 %v661_v19 }
  0x5d   :  { %385 = vperm.xlu0 %614, %v716_v6  }
  0x5e   :  { %281 = vperm.xlu1 %607, %v728_v8  }
  0x61   :  { %397 = vperm.xlu0 %614, %v733_v9  }
  0x62   :  { %608 = vset.pattern.permute.xlu1 %v658_v16 }
  0x63   :  { %301 = vperm.xlu1 %608, %v716_v6  }
  0x65   :  { %617 = vset.pattern.permute.xlu0 %v662_v20 }
  0x66   :  { %417 = vperm.xlu0 %617, %v721_v7  }
  0x67   :  { %309 = vperm.xlu1 %608, %v728_v8  }
  0x6a   :  { %618 = vset.pattern.permute.xlu0 %v663_v21 }
  0x6b   :  { %313 = vperm.xlu1 %608, %v733_v9   ;;  %441 = vperm.xlu0 %618, %v716_v6  }
  0x6f   :  { %611 = vset.pattern.permute.xlu1 %v659_v17  ;;  %453 = vperm.xlu0 %618, %v733_v9  }
  0x70   :  { %333 = vperm.xlu1 %611, %v721_v7  }
  0x73   :  { %621 = vset.pattern.permute.xlu0 %v664_v23 }
  0x74   :  { %337 = vperm.xlu1 %611, %v728_v8   ;;  %473 = vperm.xlu0 %621, %v721_v7  }
  0x78   :  { %612 = vset.pattern.permute.xlu1 %v660_v18  ;;  %622 = vset.pattern.permute.xlu0 %v665_v25 }
  0x79   :  { %357 = vperm.xlu1 %612, %v716_v6   ;;  %497 = vperm.xlu0 %622, %v716_v6  }
  0x7d   :  { %365 = vperm.xlu1 %612, %v728_v8   ;;  %509 = vperm.xlu0 %622, %v733_v9  }
  0x81   :  { %369 = vperm.xlu1 %612, %v733_v9   ;;  %v42_v32 = vpop.permute.xlu1 %41  ;;  %v27_v33 = vpop.permute.xlu0 %26  ;;  %625 = vset.pattern.permute.xlu0 %v651_v2 }
  0x82   :  { %v52_v34 = vmul.f32 %v51_v29, %v42_v32  ;;  %v38_v35 = vmul.f32 %v37_v30, %v27_v33  ;;  %535 = vperm.xlu0 %625, %v525_v31  }
  0x84   :  { %v54_v36 = vadd.f32 %v52_v34, %v38_v35  ;;  %v206_v34 = vsub.s32 4, %v782_v24 }
  0x85   :  { %615 = vset.pattern.permute.xlu1 %v661_v19  ;;  %v46_v37 = vpop.permute.xlu1 %45  ;;  %v32_v38 = vpop.permute.xlu0 %31 }
  0x86   :  { %v53_v39 = vmul.f32 %v51_v29, %v46_v37  ;;  %v39_v40 = vmul.f32 %v37_v30, %v32_v38  ;;  %389 = vperm.xlu1 %615, %v721_v7  }
  0x88   :  { %v55_v41 = vadd.f32 %v53_v39, %v39_v40 }
  0x89   :  { %v61_v42 = vpop.permute.xlu0 %60 }
  0x8a   :  { %v68_v43 = vadd.f32 %v61_v42, %v54_v36  ;;  %393 = vperm.xlu1 %615, %v728_v8   ;;  %v66_v44 = vpop.permute.xlu1 %65 }
  0x8b   :  { %v807_v45 = vadd.f32 %v66_v44, %v55_v41 }
  0x8c   :  { %v809_v46 = vmax.f32 %v68_v43, 0.0 }
  0x8d   :  { %v79_v47 = vpop.permute.xlu0 %78 }
  0x8e   :  { %v99_v48 = vrot.slane %v809_v46, %v791_v27  ;;  %616 = vset.pattern.permute.xlu1 %v662_v20  ;;  %v84_v49 = vpop.permute.xlu1 %83  ;;  %v123_v56 = vrot.slane %v809_v46, %v788_v26  ;;  %v151_v11 = vrot.slane %v809_v46, %v150_v0  ;;  %v179_v19 = vrot.slane %v809_v46, %v178_v13 }
  0x8f   :  { %413 = vperm.xlu1 %616, %v716_v6  }
  0x90   :  { %v100_v50 = vmul.f32 %v99_v48, %v79_v47  ;;  %v101_v51 = vmul.f32 %v99_v48, %v84_v49  ;;  %v234_v47 = vsub.s32 5, %v782_v24 }
  0x91   :  { %v89_v52 = vpop.permute.xlu0 %88 }
  0x92   :  { %v102_v53 = vmul.f32 %v99_v48, %v89_v52  ;;  %v94_v54 = vpop.permute.xlu1 %93 }
  0x93   :  { %v103_v55 = vmul.f32 %v99_v48, %v94_v54  ;;  %421 = vperm.xlu1 %616, %v728_v8  }
  0x96   :  { %v106_v57 = vpop.permute.xlu0 %105 }
  0x97   :  { %v124_v58 = vmul.f32 %v123_v56, %v106_v57  ;;  %425 = vperm.xlu1 %616, %v733_v9   ;;  %v110_v59 = vpop.permute.xlu1 %109 }
  0x98   :  { %v125_v60 = vmul.f32 %v123_v56, %v110_v59 }
  0x99   :  { %v128_v61 = vadd.f32 %v124_v58, %v100_v50  ;;  %v235_v50 = vrot.slane %v809_v46, %v234_v47 }
  0x9a   :  { %v129_v62 = vadd.f32 %v125_v60, %v101_v51  ;;  %v118_v63 = vpop.permute.xlu0 %117  ;;  %v262_v60 = vsub.s32 6, %v782_v24 }
  0x9b   :  { %v127_v1 = vmul.f32 %v123_v56, %v118_v63  ;;  %619 = vset.pattern.permute.xlu1 %v663_v21  ;;  %v114_v3 = vpop.permute.xlu1 %113 }
  0x9c   :  { %v126_v4 = vmul.f32 %v123_v56, %v114_v3  ;;  %445 = vperm.xlu1 %619, %v721_v7  }
  0x9d   :  { %v131_v5 = vadd.f32 %v127_v1, %v103_v55 }
  0x9e   :  { %v130_v10 = vadd.f32 %v126_v4, %v102_v53  ;;  %v263_v4 = vrot.slane %v809_v46, %v262_v60 }
  0x9f   :  { %v138_v12 = vpop.permute.xlu0 %137 }
  0xa0   :  { %v153_v14 = vmul.f32 %v151_v11, %v138_v12  ;;  %449 = vperm.xlu1 %619, %v728_v8   ;;  %v134_v15 = vpop.permute.xlu1 %133 }
  0xa1   :  { %v152_v16 = vmul.f32 %v151_v11, %v134_v15 }
  0xa2   :  { %v157_v17 = vadd.f32 %v153_v14, %v129_v62 }
  0xa3   :  { %v156_v18 = vadd.f32 %v152_v16, %v128_v61  ;;  %v527_v61 = vld [vmem:[%s903_s4 + $0x18] sm:$0xff]  ;;  %v290_v16 = vsub.s32 7, %v782_v24 }
  0xa4   :  { %620 = vset.pattern.permute.xlu1 %v664_v23  ;;  %v142_v20 = vpop.permute.xlu1 %141  ;;  %v162_v21 = vpop.permute.xlu0 %161 }
  0xa5   :  { %v154_v22 = vmul.f32 %v151_v11, %v142_v20  ;;  %v180_v28 = vmul.f32 %v179_v19, %v162_v21  ;;  %469 = vperm.xlu1 %620, %v716_v6   ;;  %v207_v6 = vrot.slane %v809_v46, %v206_v34  ;;  %v291_v20 = vrot.slane %v809_v46, %v290_v16 }
  0xa7   :  { %v158_v29 = vadd.f32 %v154_v22, %v130_v10  ;;  %v184_v30 = vadd.f32 %v180_v28, %v156_v18 }
  0xa8   :  { %v146_v31 = vpop.permute.xlu1 %145  ;;  %v174_v32 = vpop.permute.xlu0 %173 }
  0xa9   :  { %v155_v33 = vmul.f32 %v151_v11, %v146_v31  ;;  %477 = vperm.xlu1 %620, %v728_v8   ;;  %v183_v36 = vmul.f32 %v179_v19, %v174_v32 }
  0xab   :  { %v159_v35 = vadd.f32 %v155_v33, %v131_v5 }
  0xad   :  { %v187_v37 = vadd.f32 %v183_v36, %v159_v35  ;;  %481 = vperm.xlu1 %620, %v733_v9   ;;  %v166_v23 = vpop.permute.xlu1 %165  ;;  %v194_v38 = vpop.permute.xlu0 %193 }
  0xae   :  { %v181_v39 = vmul.f32 %v179_v19, %v166_v23  ;;  %v209_v41 = vmul.f32 %v207_v6, %v194_v38 }
  0xb0   :  { %v185_v40 = vadd.f32 %v181_v39, %v157_v17 }
  0xb1   :  { %623 = vset.pattern.permute.xlu1 %v665_v25  ;;  %v170_v42 = vpop.permute.xlu1 %169  ;;  %v524_v25 = vld [vmem:[%s903_s4] sm:$0xff] }
  0xb2   :  { %v213_v43 = vadd.f32 %v209_v41, %v185_v40  ;;  %v182_v44 = vmul.f32 %v179_v19, %v170_v42  ;;  %501 = vperm.xlu1 %623, %v721_v7   ;;  %v218_v9 = vpop.permute.xlu0 %217 }
  0xb3   :  { %v236_v52 = vmul.f32 %v235_v50, %v218_v9 }
  0xb4   :  { %v186_v48 = vadd.f32 %v182_v44, %v158_v29 }
  0xb6   :  { %505 = vperm.xlu1 %623, %v728_v8   ;;  %v190_v49 = vpop.permute.xlu1 %189  ;;  %v526_v8 = vld [vmem:[%s903_s4 + $0x10] sm:$0xff]  ;;  %v230_v56 = vpop.permute.xlu0 %229  ;;  %s666_s4 = smov [#allocation2]  }
  0xb7   :  { %v208_v51 = vmul.f32 %v207_v6, %v190_v49  ;;  %s561_s15 = sshll.u32 %s666_s4, 4  ;;  %s562_s15 = int_to_ptr.vmem [resolvable:$true] %s561_s15 }
  0xb8   :  { %s626_s16 = scalar_lea.vmem %s562_s15, 512  ;;  %p631_p1 = scmp.lt.s32.totalorder %s562_s15, %s562_s15 }
  0xb9   :  { %v212_v53 = vadd.f32 %v208_v51, %v184_v30  ;;  %p627_p0 = scmp.ne.s32.totalorder %s562_s15, %s626_s16  ;;  %p632_p2 = scmp.lt.s32.totalorder %s626_s16, %s626_s16 }
  0xba   :  { %624 = vset.pattern.permute.xlu1 %v651_v2  ;;  %v198_v7 = vpop.permute.xlu1 %197  ;;  %v239_v2 = vmul.f32 %v235_v50, %v230_v56 }
  0xbb   :  { %v210_v54 = vmul.f32 %v207_v6, %v198_v7  ;;  %530 = vperm.xlu1 %624, %v524_v25   ;;  %v240_v55 = vadd.f32 %v236_v52, %v212_v53  ;;  %v250_v63 = vpop.permute.xlu0 %249  ;;  %p633_p3 = por %p632_p2, %p631_p1 }
  0xbc   :  { %v265_v10 = vmul.f32 %v263_v4, %v250_v63 }
  0xbd   :  { %v214_v57 = vadd.f32 %v210_v54, %v186_v48  ;;  %p634_p4 = pnand %p633_p3, %p627_p0 }
  0xbe   :  { %v202_v58 = vpop.permute.xlu1 %201 }
  0xbf   :  { %v211_v59 = vmul.f32 %v207_v6, %v202_v58  ;;  %540 = vperm.xlu1 %624, %v526_v8  }
  0xc0   :  { %v274_v18 = vpop.permute.xlu0 %273 }
  0xc1   :  { %v215_v62 = vadd.f32 %v211_v59, %v187_v37  ;;  %v292_v22 = vmul.f32 %v291_v20, %v274_v18  ;;  %v863_v37 = vmax.f32 %v807_v45, 0.0 }
  0xc3   :  { %545 = vperm.xlu1 %624, %v527_v61   ;;  %v222_v1 = vpop.permute.xlu1 %221  ;;  %v243_v3 = vadd.f32 %v239_v2, %v215_v62  ;;  %v319_v46 = vrot.slane %v863_v37, %v791_v27  ;;  %v347_v45 = vrot.slane %v863_v37, %v788_v26  ;;  %v375_v63 = vrot.slane %v863_v37, %v150_v0 }
  0xc4   :  { %v237_v5 = vmul.f32 %v235_v50, %v222_v1  ;;  %v286_v32 = vpop.permute.xlu0 %285 }
  0xc5   :  { %v295_v23 = vmul.f32 %v291_v20, %v286_v32 }
  0xc6   :  { %v241_v11 = vadd.f32 %v237_v5, %v213_v43 }
  0xc7   :  { %v226_v12 = vpop.permute.xlu1 %225 }
  0xc8   :  { %v238_v14 = vmul.f32 %v235_v50, %v226_v12  ;;  %v269_v15 = vadd.f32 %v265_v10, %v241_v11 }
  0xc9   :  { %v306_v39 = vpop.permute.xlu0 %305 }
  0xca   :  { %v242_v17 = vadd.f32 %v238_v14, %v214_v57  ;;  %v321_v42 = vmul.f32 %v319_v46, %v306_v39 }
  0xcc   :  { %v246_v19 = vpop.permute.xlu1 %245 }
  0xcd   :  { %v264_v21 = vmul.f32 %v263_v4, %v246_v19 }
  0xce   :  { %v330_v50 = vpop.permute.xlu0 %329 }
  0xcf   :  { %v268_v28 = vadd.f32 %v264_v21, %v240_v55  ;;  %v348_v52 = vmul.f32 %v347_v45, %v330_v50 }
  0xd0   :  { %v254_v29 = vpop.permute.xlu1 %253 }
  0xd1   :  { %v266_v30 = vmul.f32 %v263_v4, %v254_v29  ;;  %v296_v31 = vadd.f32 %v292_v22, %v268_v28 }
  0xd2   :  { %v342_v8 = vpop.permute.xlu0 %341 }
  0xd3   :  { %v270_v33 = vadd.f32 %v266_v30, %v242_v17  ;;  %v351_v58 = vmul.f32 %v347_v45, %v342_v8 }
  0xd4   :  { %v258_v35 = vpop.permute.xlu1 %257 }
  0xd5   :  { %v267_v36 = vmul.f32 %v263_v4, %v258_v35 }
  0xd7   :  { %v271_v38 = vadd.f32 %v267_v36, %v243_v3  ;;  %v362_v61 = vpop.permute.xlu0 %361 }
  0xd8   :  { %v377_v1 = vmul.f32 %v375_v63, %v362_v61 }
  0xd9   :  { %v278_v6 = vpop.permute.xlu1 %277  ;;  %v299_v40 = vadd.f32 %v295_v23, %v271_v38  ;;  %v431_v23 = vrot.slane %v863_v37, %v206_v34 }
  0xda   :  { %v293_v41 = vmul.f32 %v291_v20, %v278_v6 }
  0xdc   :  { %v297_v43 = vadd.f32 %v293_v41, %v269_v15  ;;  %v386_v12 = vpop.permute.xlu0 %385  ;;  %v403_v15 = vrot.slane %v863_v37, %v178_v13 }
  0xdd   :  { %v282_v44 = vpop.permute.xlu1 %281 }
  0xde   :  { %v294_v48 = vmul.f32 %v291_v20, %v282_v44  ;;  %v325_v9 = vadd.f32 %v321_v42, %v297_v43  ;;  %v404_v18 = vmul.f32 %v403_v15, %v386_v12  ;;  %v459_v44 = vrot.slane %v863_v37, %v234_v47 }
  0xe0   :  { %v298_v49 = vadd.f32 %v294_v48, %v270_v33  ;;  %v398_v0 = vpop.permute.xlu0 %397 }
  0xe2   :  { %v302_v51 = vpop.permute.xlu1 %301 }
  0xe3   :  { %v320_v25 = vmul.f32 %v319_v46, %v302_v51 }
  0xe5   :  { %v324_v53 = vadd.f32 %v320_v25, %v296_v31  ;;  %v407_v31 = vmul.f32 %v403_v15, %v398_v0  ;;  %v418_v33 = vpop.permute.xlu0 %417 }
  0xe6   :  { %v310_v7 = vpop.permute.xlu1 %309  ;;  %v433_v38 = vmul.f32 %v431_v23, %v418_v33 }
  0xe7   :  { %v322_v54 = vmul.f32 %v319_v46, %v310_v7  ;;  %v352_v55 = vadd.f32 %v348_v52, %v324_v53 }
  0xe9   :  { %v326_v27 = vadd.f32 %v322_v54, %v298_v49 }
  0xea   :  { %v314_v56 = vpop.permute.xlu1 %313  ;;  %v442_v42 = vpop.permute.xlu0 %441 }
  0xeb   :  { %v323_v57 = vmul.f32 %v319_v46, %v314_v56  ;;  %v487_v56 = vrot.slane %v863_v37, %v262_v60 }
  0xed   :  { %v327_v59 = vadd.f32 %v323_v57, %v299_v40 }
  0xee   :  { %v454_v34 = vpop.permute.xlu0 %453 }
  0xef   :  { %v334_v2 = vpop.permute.xlu1 %333  ;;  %v355_v62 = vadd.f32 %v351_v58, %v327_v59  ;;  %v463_v7 = vmul.f32 %v459_v44, %v454_v34 }
  0xf0   :  { %v349_v26 = vmul.f32 %v347_v45, %v334_v2 }
  0xf2   :  { %v353_v3 = vadd.f32 %v349_v26, %v325_v9  ;;  %v460_v9 = vmul.f32 %v459_v44, %v442_v42 }
  0xf3   :  { %v338_v4 = vpop.permute.xlu1 %337 }
  0xf4   :  { %v350_v5 = vmul.f32 %v347_v45, %v338_v4  ;;  %v381_v10 = vadd.f32 %v377_v1, %v353_v3  ;;  %v515_v1 = vrot.slane %v863_v37, %v290_v16 }
  0xf6   :  { %v354_v11 = vadd.f32 %v350_v5, %v326_v27 }
  0xf8   :  { %v358_v14 = vpop.permute.xlu1 %357 }
  0xf9   :  { %v376_v17 = vmul.f32 %v375_v63, %v358_v14 }
  0xfb   :  { %v380_v19 = vadd.f32 %v376_v17, %v352_v55  ;;  %v474_v55 = vpop.permute.xlu0 %473 }
  0xfc   :  { %v366_v20 = vpop.permute.xlu1 %365  ;;  %v489_v57 = vmul.f32 %v487_v56, %v474_v55 }
  0xfd   :  { %v378_v21 = vmul.f32 %v375_v63, %v366_v20  ;;  %v408_v22 = vadd.f32 %v404_v18, %v380_v19 }
  0xff   :  { %v382_v28 = vadd.f32 %v378_v21, %v354_v11 }
 0x100   :  { %v370_v29 = vpop.permute.xlu1 %369 }
 0x101   :  { %v379_v30 = vmul.f32 %v375_v63, %v370_v29  ;;  %v498_v63 = vpop.permute.xlu0 %497 }
 0x102   :  { %v516_v4 = vmul.f32 %v515_v1, %v498_v63 }
 0x103   :  { %v383_v32 = vadd.f32 %v379_v30, %v355_v62 }
 0x105   :  { %v390_v35 = vpop.permute.xlu1 %389  ;;  %v411_v36 = vadd.f32 %v407_v31, %v383_v32  ;;  %v510_v14 = vpop.permute.xlu0 %509 }
 0x106   :  { %v405_v13 = vmul.f32 %v403_v15, %v390_v35  ;;  %v519_v18 = vmul.f32 %v515_v1, %v510_v14 }
 0x108   :  { %v409_v39 = vadd.f32 %v405_v13, %v381_v10 }
 0x109   :  { %v394_v6 = vpop.permute.xlu1 %393  ;;  %v536_v0 = vpop.permute.xlu0 %535 }
 0x10a   :  { %v406_v40 = vmul.f32 %v403_v15, %v394_v6  ;;  %v437_v46 = vadd.f32 %v433_v38, %v409_v39 }
 0x10c   :  { %v410_v41 = vadd.f32 %v406_v40, %v382_v28 }
 0x10e   :  { %v414_v43 = vpop.permute.xlu1 %413 }
 0x10f   :  { %v432_v48 = vmul.f32 %v431_v23, %v414_v43 }
 0x111   :  { %v436_v49 = vadd.f32 %v432_v48, %v408_v22 }
 0x112   :  { %v422_v50 = vpop.permute.xlu1 %421 }
 0x113   :  { %v434_v51 = vmul.f32 %v431_v23, %v422_v50  ;;  %v464_v45 = vadd.f32 %v460_v9, %v436_v49 }
 0x115   :  { %v438_v25 = vadd.f32 %v434_v51, %v410_v41 }
 0x116   :  { %v426_v52 = vpop.permute.xlu1 %425 }
 0x117   :  { %v435_v53 = vmul.f32 %v431_v23, %v426_v52 }
 0x119   :  { %v439_v54 = vadd.f32 %v435_v53, %v411_v36 }
 0x11b   :  { %v446_v8 = vpop.permute.xlu1 %445  ;;  %v467_v27 = vadd.f32 %v463_v7, %v439_v54 }
 0x11c   :  { %v461_v47 = vmul.f32 %v459_v44, %v446_v8 }
 0x11e   :  { %v465_v58 = vadd.f32 %v461_v47, %v437_v46 }
 0x11f   :  { %v450_v59 = vpop.permute.xlu1 %449 }
 0x120   :  { %v462_v61 = vmul.f32 %v459_v44, %v450_v59  ;;  %v493_v2 = vadd.f32 %v489_v57, %v465_v58 }
 0x122   :  { %v466_v62 = vadd.f32 %v462_v61, %v438_v25 }
 0x124   :  { %v470_v26 = vpop.permute.xlu1 %469 }
 0x125   :  { %v488_v3 = vmul.f32 %v487_v56, %v470_v26 }
 0x127   :  { %v492_v5 = vadd.f32 %v488_v3, %v464_v45 }
 0x128   :  { %v478_v10 = vpop.permute.xlu1 %477 }
 0x129   :  { %v490_v11 = vmul.f32 %v487_v56, %v478_v10  ;;  %v520_v12 = vadd.f32 %v516_v4, %v492_v5 }
 0x12b   :  { %v494_v60 = vadd.f32 %v490_v11, %v466_v62 }
 0x12c   :  { %v482_v15 = vpop.permute.xlu1 %481 }
 0x12d   :  { %v491_v17 = vmul.f32 %v487_v56, %v482_v15 }
 0x12f   :  { %v495_v19 = vadd.f32 %v491_v17, %v467_v27 }
 0x131   :  { %v502_v20 = vpop.permute.xlu1 %501  ;;  %v523_v21 = vadd.f32 %v519_v18, %v495_v19 }
 0x132   :  { %v517_v22 = vmul.f32 %v515_v1, %v502_v20 }
 0x134   :  { %v521_v28 = vadd.f32 %v517_v22, %v493_v2 }
 0x135   :  { %v506_v24 = vpop.permute.xlu1 %505 }
 0x136   :  { %v518_v29 = vmul.f32 %v515_v1, %v506_v24  ;;  %v549_v16 = vadd.f32 %v536_v0, %v521_v28 }
 0x138   :  { %553 = vst [vmem:[#allocation2 + $0x8] sm:$0xff] %v549_v16  ;;  %v522_v37 = vadd.f32 %v518_v29, %v494_v60 }
 0x13a   :  { %v531_v30 = vpop.permute.xlu1 %530 }
 0x13b   :  { %v548_v31 = vadd.f32 %v531_v30, %v520_v12 }
 0x13d   :  { %552 = vst [vmem:[#allocation2] sm:$0xff] %v548_v31 }
 0x13e   :  { %v541_v32 = vpop.permute.xlu1 %540 }
 0x13f   :  { %v550_v33 = vadd.f32 %v541_v32, %v522_v37 }
 0x141   :  { %554 = vst [vmem:[#allocation2 + $0x10] sm:$0xff] %v550_v33 }
 0x142   :  { %v546_v35 = vpop.permute.xlu1 %545 }
 0x143   :  { %v551_v36 = vadd.f32 %v546_v35, %v523_v21 }
 0x145   :  { %555 = vst [vmem:[#allocation2 + $0x18] sm:$0xff] %v551_v36 }
 0x146   :  { %637 = shalt.err (!%p634_p4)
}
 0x147   :  { %s638_s19 = scalar_lea.hbm %s904_s5, 512 }
 0x148   :  { %p639_p5 = scmp.ne.s32.totalorder %s904_s5, %s638_s19  ;;  %p642_p6 = scmp.lt.u32.totalorder %s638_s19, %s904_s5 }
 0x14a   :  { %p644_p7 = pnand %p642_p6, %p639_p5 }
 0x14c   :  { %647 = shalt.err (!%p644_p7)
}
 0x14d   :  { %s667_s24 = smov 128   ;;  %s668_s25 = smov 8  }
 0x14e   :  { %567 = dma.vmem_to_hbm [thread:$0]  %s562_s15, 512, %s904_s5, [#allocation3], %s667_s24, %s667_s24, %s668_s25  }
 0x14f   :  { %648 = dma.done.wait [#allocation3], 512  }
 0x150   :  { %649 = vsyncadd [#allocation3], 4294966784 }
 0x151   :  { %571 = vsyncpa [#allocation3], 1 }

</bundles_post_ra>
